<compile_context>
chip_gen: v7x
topology: tpu7x:2x2x1
jax: 0.10.0
libtpu: 0.0.40
codegen_flags: <defaults>
</compile_context>

<pallas_src>
import jax
import jax.numpy as jnp
from jax.experimental import pallas as pl
from jax.experimental.pallas import tpu as pltpu

# ----------------------------- configuration ------------------------------
B = 2          # batch (at real scale, batch many images per pallas_call —
               # at these toy shapes the kernel is launch-overhead bound)
CIN = 3        # input image channels (RGB, like the torch module)
H = W = 16     # small spatial size for the synthetic run
KSZ = 3        # conv stem kernel size
FEAT = 128     # stand-in backbone feature dim (efficientnet_b1 would be 1280)
HEAD_DIMS = {"pathology": 2, "region": 3, "depth": 2}
NH = sum(HEAD_DIMS.values())      # 7 logits total
NH_PAD = 128                      # lane-pad the fused head output
K_RAW = KSZ * KSZ * CIN           # 27 im2col columns
K_PAD = 32                        # sublane-friendly padding of K
P = H * W                         # pixels per image
ROWS = B * P                      # flattened patch rows (512)
TILE_ROWS = 256                   # row tile; 2 bufs * TILE_ROWS*(K_PAD+FEAT)*2B
                                  # stays far under the 32 MiB scoped default,
                                  # safe on v5e/v6e (128 MiB) and v7x (64 MiB)
assert ROWS % TILE_ROWS == 0


# ------------------------------ Pallas kernel ------------------------------
def _mtl_cnn_kernel(patches_ref, pool_ref, wc_ref, bc_ref, wh_ref, bh_ref,
                    out_ref, acc_ref):
    # patches_ref: [TILE_ROWS, K_PAD]  bf16 im2col'd image patches (row tile)
    # pool_ref:    [B, TILE_ROWS]      f32 block-diagonal GAP matrix slice (1/P)
    # wc_ref:      [K_PAD, FEAT]       bf16 conv-stem weight (im2col layout)
    # bc_ref:      [1, FEAT]           f32 conv-stem bias
    # wh_ref:      [FEAT, NH_PAD]      bf16 fused head weights (path|region|depth|0)
    # bh_ref:      [1, NH_PAD]         f32 fused head bias
    # out_ref:     [B, NH_PAD]         f32 fused logits (same block every step)
    # acc_ref:     [B, FEAT]           f32 VMEM scratch: pooled-feature accumulator
    step = pl.program_id(0)

    @pl.when(step == 0)
    def _init():
        acc_ref[...] = jnp.zeros_like(acc_ref)

    # conv stem on the MXU: bf16 x bf16 -> f32 accumulation
    acts = jnp.dot(patches_ref[...], wc_ref[...],
                   preferred_element_type=jnp.float32)
    acts = jnp.maximum(acts + bc_ref[...], 0.0)            # bias + ReLU in f32

    # global-average-pool partial sums as a second MXU matmul (f32 in, f32 acc)
    acc_ref[...] += jnp.dot(pool_ref[...], acts,
                            preferred_element_type=jnp.float32)

    @pl.when(step == pl.num_programs(0) - 1)
    def _finalize():
        feats = acc_ref[...]                                # [B, FEAT] f32
        out_ref[...] = (jnp.dot(feats.astype(jnp.bfloat16), wh_ref[...],
                                preferred_element_type=jnp.float32)
                        + bh_ref[...])                      # all 3 heads, f32 add


# --------------------------------- wrapper ---------------------------------
def fixed_multi_task_cnn_forward(x_nchw, params):
    """x_nchw: [B, 3, H, W] float32 -> dict of logits, matching the torch module."""
    b, c, h, w = x_nchw.shape
    assert (b, c, h, w) == (B, CIN, H, W)

    # ---- glue: NCHW -> NHWC, zero pad, im2col (3x3, stride 1, pad 1) ----
    # allow_input_fusion below lets XLA fuse this pad/concat/reshape/cast chain
    # into the pallas_call so the 9x-expanded patch matrix need not be
    # materialized in HBM.
    x_nhwc = jnp.transpose(x_nchw, (0, 2, 3, 1))
    xp = jnp.pad(x_nhwc, ((0, 0), (1, 1), (1, 1), (0, 0)))
    cols = []
    for dy in range(KSZ):
        for dx in range(KSZ):
            cols.append(xp[:, dy:dy + H, dx:dx + W, :])           # [B, H, W, CIN]
    patches = jnp.concatenate(cols, axis=-1).reshape(ROWS, K_RAW)
    patches = jnp.pad(patches, ((0, 0), (0, K_PAD - K_RAW)))      # [ROWS, K_PAD]
    patches = patches.astype(jnp.bfloat16)                        # MXU-native dtype

    # block-diagonal pooling matrix: pool[b, b*P + p] = 1/P  (GAP via the MXU)
    pool = jnp.kron(jnp.eye(B, dtype=jnp.float32),
                    jnp.full((1, P), 1.0 / P, jnp.float32))       # [B, ROWS]

    wc = params["wc"].astype(jnp.bfloat16)
    wh = params["wh"].astype(jnp.bfloat16)
    bc = params["bc"]
    bh = params["bh"]

    fused_logits = pl.pallas_call(
        _mtl_cnn_kernel,
        out_shape=jax.ShapeDtypeStruct((B, NH_PAD), jnp.float32),
        grid_spec=pltpu.PrefetchScalarGridSpec(
            num_scalar_prefetch=0,
            grid=(ROWS // TILE_ROWS,),
            in_specs=[
                pl.BlockSpec((TILE_ROWS, K_PAD), lambda r: (r, 0)),   # patches
                pl.BlockSpec((B, TILE_ROWS), lambda r: (0, r)),       # pool slice
                pl.BlockSpec((K_PAD, FEAT), lambda r: (0, 0)),        # wc
                pl.BlockSpec((1, FEAT), lambda r: (0, 0)),            # bc
                pl.BlockSpec((FEAT, NH_PAD), lambda r: (0, 0)),       # wh
                pl.BlockSpec((1, NH_PAD), lambda r: (0, 0)),          # bh
            ],
            out_specs=pl.BlockSpec((B, NH_PAD), lambda r: (0, 0)),
            scratch_shapes=[pltpu.VMEM((B, FEAT), jnp.float32)],
        ),
        compiler_params=pltpu.CompilerParams(
            # Row-tile axis accumulates into the same output block -> "arbitrary".
            # TODO(synk): at real sizes add a leading "parallel" batch/row-group
            #             axis so both v7x TensorCores get work.
            dimension_semantics=("arbitrary",),
            vmem_limit_bytes=32 * 1024 * 1024,
            allow_input_fusion=[True, False, False, False, False, False],
        ),
    )(patches, pool, wc, bc, wh, bh)

    # ---- glue: split fused logits into the task dict ----
    outputs = {}
    off = 0
    for task, n in HEAD_DIMS.items():
        outputs[task] = fused_logits[:, off:off + n]
        off += n
    return outputs


# ------------------------- deterministic parameters ------------------------
def make_params(seed=0):
    key = jax.random.PRNGKey(seed)
    k_conv, *k_heads = jax.random.split(key, 1 + len(HEAD_DIMS))

    # conv stem weight [KSZ, KSZ, CIN, FEAT] -> im2col layout [9*CIN, FEAT]
    wc = 0.05 * jax.random.normal(k_conv, (KSZ, KSZ, CIN, FEAT), jnp.float32)
    wc = wc.reshape(K_RAW, FEAT)
    wc = jnp.pad(wc, ((0, K_PAD - K_RAW), (0, 0)))                 # zero pad rows
    bc = jnp.zeros((1, FEAT), jnp.float32)

    # heads: Xavier-uniform weights (gain=1), zero bias — same as the torch init
    head_w_cols = []
    for kh, (task, n) in zip(k_heads, HEAD_DIMS.items()):
        limit = (6.0 / (FEAT + n)) ** 0.5
        w = jax.random.uniform(kh, (FEAT, n), jnp.float32, -limit, limit)
        head_w_cols.append(w)
    wh = jnp.concatenate(head_w_cols, axis=1)                      # [FEAT, 7]
    wh = jnp.pad(wh, ((0, 0), (0, NH_PAD - NH)))                   # [FEAT, NH_PAD]
    bh = jnp.zeros((1, NH_PAD), jnp.float32)

    return {"wc": wc, "bc": bc, "wh": wh, "bh": bh}


# --------------------------- pure-JAX f32 reference -------------------------
def _reference_forward(x_nchw, params):
    x_nhwc = jnp.transpose(x_nchw, (0, 2, 3, 1))
    xp = jnp.pad(x_nhwc, ((0, 0), (1, 1), (1, 1), (0, 0)))
    cols = [xp[:, dy:dy + H, dx:dx + W, :]
            for dy in range(KSZ) for dx in range(KSZ)]
    patches = jnp.concatenate(cols, axis=-1).reshape(B, P, K_RAW)
    acts = jnp.einsum("bpk,kf->bpf", patches, params["wc"][:K_RAW]) + params["bc"]
    acts = jnp.maximum(acts, 0.0)
    feats = acts.mean(axis=1)
    return feats @ params["wh"][:, :NH] + params["bh"][:, :NH]


# ----------------------------------- main -----------------------------------
if __name__ == "__main__":
    key = jax.random.PRNGKey(0)
    x = jax.random.normal(key, (B, CIN, H, W), jnp.float32)        # NCHW, like torch
    params = make_params(seed=0)

    outputs = fixed_multi_task_cnn_forward(x, params)
    outputs = jax.block_until_ready(outputs)

    assert outputs["pathology"].shape == (B, 2)
    assert outputs["region"].shape == (B, 3)
    assert outputs["depth"].shape == (B, 2)

    # light numerical check against a pure-JAX f32 reference (bf16 MXU tolerance)
    ref = _reference_forward(x, params)
    got = jnp.concatenate([outputs[t] for t in HEAD_DIMS], axis=1)
    max_err = float(jnp.max(jnp.abs(got - ref)))
    assert jnp.allclose(got, ref, atol=5e-2, rtol=5e-2), max_err

    print("KERNEL_OK")
</pallas_src>

<mosaic_0001>
module attributes {stable_mosaic.version = 11 : i64} {
  func.func @_mtl_cnn_kernel(%arg0: i32, %arg1: memref<256x32xbf16, #tpu.memory_space<vmem>>, %arg2: memref<2x256xf32, #tpu.memory_space<vmem>>, %arg3: memref<32x128xbf16, #tpu.memory_space<vmem>>, %arg4: memref<1x128xf32, #tpu.memory_space<vmem>>, %arg5: memref<128x128xbf16, #tpu.memory_space<vmem>>, %arg6: memref<1x128xf32, #tpu.memory_space<vmem>>, %arg7: memref<2x128xf32, #tpu.memory_space<vmem>>, %arg8: memref<2x128xf32, #tpu.memory_space<vmem>>) attributes {dimension_semantics = [#tpu.dimension_semantics<arbitrary>], iteration_bounds = array<i64: 2>, scalar_prefetch = 0 : i64, scratch_operands = 1 : i64, tpu.core_type = #tpu.core_type<tc>, window_params = [{transform_indices = @transform_0, window_bounds = array<i64: 256, 32>}, {transform_indices = @transform_1, window_bounds = array<i64: 2, 256>}, {pipeline_mode = #tpu.pipeline_mode<synchronous>, transform_indices = @transform_2, window_bounds = array<i64: 32, 128>}, {pipeline_mode = #tpu.pipeline_mode<synchronous>, transform_indices = @transform_3, window_bounds = array<i64: 1, 128>}, {pipeline_mode = #tpu.pipeline_mode<synchronous>, transform_indices = @transform_4, window_bounds = array<i64: 128, 128>}, {pipeline_mode = #tpu.pipeline_mode<synchronous>, transform_indices = @transform_5, window_bounds = array<i64: 1, 128>}, {pipeline_mode = #tpu.pipeline_mode<synchronous>, transform_indices = @transform_6, window_bounds = array<i64: 2, 128>}]} {
    %c0_i32 = arith.constant 0 : i32
    %0 = arith.cmpi eq, %arg0, %c0_i32 : i32
    %1 = arith.extui %0 : i1 to i32
    %c0_i32_0 = arith.constant 0 : i32
    %2 = arith.cmpi ne, %1, %c0_i32_0 : i32
    scf.if %2 {
      %cst_15 = arith.constant 0.000000e+00 : f32
      %19 = vector.broadcast %cst_15 : f32 to vector<2x128xf32>
      %c0_16 = arith.constant 0 : index
      %c0_17 = arith.constant 0 : index
      %20 = vector.load %arg8[%c0_16, %c0_17] : memref<2x128xf32, #tpu.memory_space<vmem>>, vector<2x128xf32>
      tpu.vector_store %arg8[%c0_16, %c0_17], %19 {strides = array<i32>} : memref<2x128xf32, #tpu.memory_space<vmem>>, vector<2x128xf32>,
    } else {
    }
    %c0 = arith.constant 0 : index
    %c0_1 = arith.constant 0 : index
    %3 = vector.load %arg1[%c0, %c0_1] : memref<256x32xbf16, #tpu.memory_space<vmem>>, vector<256x32xbf16>
    %c0_2 = arith.constant 0 : index
    %c0_3 = arith.constant 0 : index
    %4 = vector.load %arg3[%c0_2, %c0_3] : memref<32x128xbf16, #tpu.memory_space<vmem>>, vector<32x128xbf16>
    %cst = arith.constant dense<0.000000e+00> : vector<256x128xf32>
    %5 = tpu.matmul %3, %4, %cst {dimension_numbers = #tpu.dot_dimension_numbers<[1], [0], [0], [1], [0, 0, 1, 1], [], []>} : vector<256x32xbf16>, vector<32x128xbf16>, vector<256x128xf32> -> vector<256x128xf32>
    %c0_4 = arith.constant 0 : index
    %c0_5 = arith.constant 0 : index
    %6 = vector.load %arg4[%c0_4, %c0_5] : memref<1x128xf32, #tpu.memory_space<vmem>>, vector<1x128xf32>
    %7 = vector.broadcast %6 : vector<1x128xf32> to vector<256x128xf32>
    %8 = arith.addf %5, %7 : vector<256x128xf32>
    %cst_6 = arith.constant 0.000000e+00 : f32
    %9 = vector.broadcast %cst_6 : f32 to vector<256x128xf32>
    %10 = arith.maximumf %8, %9 : vector<256x128xf32>
    %c0_7 = arith.constant 0 : index
    %c0_8 = arith.constant 0 : index
    %11 = vector.load %arg8[%c0_7, %c0_8] : memref<2x128xf32, #tpu.memory_space<vmem>>, vector<2x128xf32>
    %c0_9 = arith.constant 0 : index
    %c0_10 = arith.constant 0 : index
    %12 = vector.load %arg2[%c0_9, %c0_10] : memref<2x256xf32, #tpu.memory_space<vmem>>, vector<2x256xf32>
    %cst_11 = arith.constant dense<0.000000e+00> : vector<2x128xf32>
    %13 = tpu.matmul %12, %10, %cst_11 {dimension_numbers = #tpu.dot_dimension_numbers<[1], [0], [0], [1], [0, 0, 1, 1], [], []>} : vector<2x256xf32>, vector<256x128xf32>, vector<2x128xf32> -> vector<2x128xf32>
    %14 = arith.addf %11, %13 : vector<2x128xf32>
    %c0_12 = arith.constant 0 : index
    %c0_13 = arith.constant 0 : index
    %15 = vector.load %arg8[%c0_12, %c0_13] : memref<2x128xf32, #tpu.memory_space<vmem>>, vector<2x128xf32>
    tpu.vector_store %arg8[%c0_12, %c0_13], %14 {strides = array<i32>} : memref<2x128xf32, #tpu.memory_space<vmem>>, vector<2x128xf32>,
    %c1_i32 = arith.constant 1 : i32
    %16 = arith.cmpi eq, %arg0, %c1_i32 : i32
    %17 = arith.extui %16 : i1 to i32
    %c0_i32_14 = arith.constant 0 : i32
    %18 = arith.cmpi ne, %17, %c0_i32_14 : i32
    scf.if %18 {
      %c0_15 = arith.constant 0 : index
      %c0_16 = arith.constant 0 : index
      %19 = vector.load %arg8[%c0_15, %c0_16] : memref<2x128xf32, #tpu.memory_space<vmem>>, vector<2x128xf32>
      %20 = arith.truncf %19 : vector<2x128xf32> to vector<2x128xbf16>
      %c0_17 = arith.constant 0 : index
      %c0_18 = arith.constant 0 : index
      %21 = vector.load %arg5[%c0_17, %c0_18] : memref<128x128xbf16, #tpu.memory_space<vmem>>, vector<128x128xbf16>
      %cst_19 = arith.constant dense<0.000000e+00> : vector<2x128xf32>
      %22 = tpu.matmul %20, %21, %cst_19 {dimension_numbers = #tpu.dot_dimension_numbers<[1], [0], [0], [1], [0, 0, 1, 1], [], []>} : vector<2x128xbf16>, vector<128x128xbf16>, vector<2x128xf32> -> vector<2x128xf32>
      %c0_20 = arith.constant 0 : index
      %c0_21 = arith.constant 0 : index
      %23 = vector.load %arg6[%c0_20, %c0_21] : memref<1x128xf32, #tpu.memory_space<vmem>>, vector<1x128xf32>
      %24 = vector.broadcast %23 : vector<1x128xf32> to vector<2x128xf32>
      %25 = arith.addf %22, %24 : vector<2x128xf32>
      %c0_22 = arith.constant 0 : index
      %c0_23 = arith.constant 0 : index
      %26 = vector.load %arg7[%c0_22, %c0_23] : memref<2x128xf32, #tpu.memory_space<vmem>>, vector<2x128xf32>
      tpu.vector_store %arg7[%c0_22, %c0_23], %25 {strides = array<i32>} : memref<2x128xf32, #tpu.memory_space<vmem>>, vector<2x128xf32>,
    } else {
    }
    return
  }
  func.func @transform_0(%arg0: i32) -> (i32, i32) {
    %c0_i32 = arith.constant 0 : i32
    %c0_i32_0 = arith.constant 0 : i32
    return %arg0, %c0_i32 : i32, i32
  }
  func.func @transform_1(%arg0: i32) -> (i32, i32) {
    %c0_i32 = arith.constant 0 : i32
    %c0_i32_0 = arith.constant 0 : i32
    return %c0_i32, %arg0 : i32, i32
  }
  func.func @transform_2(%arg0: i32) -> (i32, i32) {
    %c0_i32 = arith.constant 0 : i32
    %c0_i32_0 = arith.constant 0 : i32
    %c0_i32_1 = arith.constant 0 : i32
    return %c0_i32, %c0_i32_0 : i32, i32
  }
  func.func @transform_3(%arg0: i32) -> (i32, i32) {
    %c0_i32 = arith.constant 0 : i32
    %c0_i32_0 = arith.constant 0 : i32
    %c0_i32_1 = arith.constant 0 : i32
    return %c0_i32, %c0_i32_0 : i32, i32
  }
  func.func @transform_4(%arg0: i32) -> (i32, i32) {
    %c0_i32 = arith.constant 0 : i32
    %c0_i32_0 = arith.constant 0 : i32
    %c0_i32_1 = arith.constant 0 : i32
    return %c0_i32, %c0_i32_0 : i32, i32
  }
  func.func @transform_5(%arg0: i32) -> (i32, i32) {
    %c0_i32 = arith.constant 0 : i32
    %c0_i32_0 = arith.constant 0 : i32
    %c0_i32_1 = arith.constant 0 : i32
    return %c0_i32, %c0_i32_0 : i32, i32
  }
  func.func @transform_6(%arg0: i32) -> (i32, i32) {
    %c0_i32 = arith.constant 0 : i32
    %c0_i32_0 = arith.constant 0 : i32
    %c0_i32_1 = arith.constant 0 : i32
    return %c0_i32, %c0_i32_0 : i32, i32
  }
}

</mosaic_0001>

<bundles_post_ra>
// kernel: tpu_custom_call.1
= control target key start
LH: loop header
LB: loop body
LE: loop exit
PB: predicated region body
PF: predicated region fallthrough
CT: control target
= control target key end

     0   :  { %11 = vsyncpa [#allocation4], 0  ;;  %s1240_s21 = smov 0   ;;  %s1398_s0 = inlined_call_operand.vmem [shape: bf16[512,32], index: 0, kind: input, shape index: {}]   ;;  %s1399_s1 = inlined_call_operand.vmem [shape: f32[2,512], index: 1, kind: input, shape index: {}]   ;;  %s1400_s2 = inlined_call_operand.vmem [shape: bf16[32,128], index: 2, kind: input, shape index: {}]   ;;  %s1401_s3 = inlined_call_operand.vmem [shape: f32[1,128], index: 3, kind: input, shape index: {}]   ;;  %s1402_s4 = inlined_call_operand.vmem [shape: bf16[128,128], index: 4, kind: input, shape index: {}]   ;;  %s1403_s5 = inlined_call_operand.vmem [shape: f32[1,128], index: 5, kind: input, shape index: {}]   ;;  %s1404_s6 = inlined_call_operand.hbm [shape: f32[2,128], index: 6, kind: output, shape index: {}]  }
   0x1 LB: > { %s1246_s22 = sadd.s32 4294967295, %s1199_s21   ;;  %p909_p0 = scmp.ge.s32.totalorder %s1199_s21, 1  ;;  %s1199_s21 = sphi %s1240_s21, %s17_s21  }
   0x2   : > { %p220_p1 = scmp.lt.s32.totalorder %s1199_s21, 3 }
   0x4   : > { %p221_p2 = pnand %p909_p0, %p220_p1 }
   0x5   : > { %s910_s23 = sshll.u32 (!%p221_p2), %s1246_s22, 5  ;;  %s912_s24 = sshll.u32 (!%p221_p2), %s1246_s22, 1 }
   0x6   : > { %224 = sbr.rel (%p221_p2) target bundleno = 752 (0x2f0), region = 44  ;;  %p251_p3 = scmp.lt.s32.totalorder (!%p221_p2), %s910_s23, 63 }
   0x7   : > { %p257_p4 = scmp.lt.s32.totalorder (!%p221_p2), %s912_s24, 3  ;;  %p914_p5 = scmp.ne.s32.totalorder (!%p221_p2), %s1246_s22, 0 }
   0xd   : > { %s1406_s23 = smov (!%p251_p3, %s910_s23), 63  ;;  %s1408_s24 = smov (!%p257_p4, %s912_s24), 3 }
   0xe   : > { %s911_s25 = sshll.u32 %s1406_s23, 2  ;;  %s913_s29 = sshll.u32 %s1408_s24, 1  ;;  %v1201_v0 = vmov (!%p914_p5), 0.0  }
   0xf   : > { %s1255_s28 = scalar_lea.vmem %s1398_s0, %s911_s25  ;;  %s1260_s8 = scalar_lea.vmem %s1399_s1, %s913_s29  ;;  %267 = vst [vmem:[#allocation2] sm:$0x3] (!%p914_p5), %v1201_v0 }
  0x10   : > { %266 = sbr.rel (%p914_p5) target bundleno = 23 (0x17), region = 48 }
  0x17 PF: > { %v1137_v1 = vld [vmem:[%s1400_s2] sm:$0xff]   ;;  %v1138_v2 = vld [vmem:[%s1400_s2 + $0x8] sm:$0xff]   ;;  %vm403_vm0 = vcmask 261120   ;;  %v1143_v7 = vld [vmem:[%s1255_s28 + $0x10] sm:$0xff]   ;;  %p951_p6 = scmp.ne.s32.totalorder %s1246_s22, 1 }
  0x18   : > { %1027 = vmatprep.subr.bf16.mxu0 %v1137_v1  ;;  %1115 = vmatprep.subr.bf16.mxu1 %v1137_v1  ;;  %v1139_v3 = vld [vmem:[%s1255_s28] sm:$0xff]   ;;  %v1141_v5 = vld [vmem:[%s1255_s28 + $0x8] sm:$0xff]   ;;  %v1144_v8 = vld [vmem:[%s1255_s28 + $0x50] sm:$0xff]   ;;  %vm1203_vm1 = vmmov (!%p951_p6), 0  }
  0x19   : > { %1028 = vmatpush3.bf16.msra.mxu0 %v1137_v1  ;;  %1117 = vmatpush3.bf16.msra.mxu1 %v1137_v1  ;;  %v1140_v4 = vld [vmem:[%s1255_s28 + $0x40] sm:$0xff]   ;;  %v1142_v6 = vld [vmem:[%s1255_s28 + $0x48] sm:$0xff]   ;;  %v1145_v9 = vld [vmem:[%s1255_s28 + $0x18] sm:$0xff]  }
  0x1a   : > { %1029 = vmatprep.subr.bf16.mxu0 %v1138_v2  ;;  %1116 = vmatprep.subr.bf16.mxu1 %v1138_v2  ;;  %v1146_v10 = vld [vmem:[%s1255_s28 + $0x58] sm:$0xff]   ;;  %v1147_v11 = vld [vmem:[%s1255_s28 + $0x20] sm:$0xff]   ;;  %v1149_v13 = vld [vmem:[%s1255_s28 + $0x28] sm:$0xff]  }
  0x1b   : > { %1031 = vmatprep.mubr.msk.bf16.mxu0 %vm403_vm0, %v1139_v3  ;;  %1047 = vmatprep.mubr.msk.bf16.mxu1 %vm403_vm0, %v1140_v4  ;;  %v1148_v12 = vld [vmem:[%s1255_s28 + $0x60] sm:$0xff]   ;;  %v1150_v14 = vld [vmem:[%s1255_s28 + $0x68] sm:$0xff]   ;;  %v1151_v15 = vld [vmem:[%s1255_s28 + $0x30] sm:$0xff]  }
  0x1c   : > { %v1152_v16 = vld [vmem:[%s1255_s28 + $0x70] sm:$0xff]   ;;  %v1153_v17 = vld [vmem:[%s1255_s28 + $0x38] sm:$0xff]   ;;  %v1302_v19 = vld.sshfl [vmem:[%s1260_s8] sm:$0x33 pattern:$0x76325410] }
  0x1d   : > { %1030 = vmatpush3.bf16.msra.mxu0 %v1138_v2  ;;  %1118 = vmatpush3.bf16.msra.mxu1 %v1138_v2  ;;  %v1154_v18 = vld [vmem:[%s1255_s28 + $0x78] sm:$0xff]   ;;  %v655_v20 = vcombine.high %v1302_v19, %v1302_v19  ;;  %v1309_v21 = vld [vmem:[%s1401_s3] ss:$0 sm:$0xff] }
  0x20   : > { %1032 = vmatmul.mubr.msk.bf16.vlgmr.msra.gmra.mrb[0].mxu0 %vm403_vm0, %v1141_v5  ;;  %1048 = vmatmul.mubr.msk.bf16.vlgmr.msra.gmra.mrb[0].mxu1 %vm403_vm0, %v1142_v6 }
  0x21   : > { %1035 = vmatprep.mubr.msk.bf16.mxu0 %vm403_vm0, %v1143_v7  ;;  %1051 = vmatprep.mubr.msk.bf16.mxu1 %vm403_vm0, %v1144_v8 }
  0x28   : > { %1036 = vmatmul.mubr.msk.bf16.gmra.mrb[4].mxu0 %vm403_vm0, %v1145_v9  ;;  %1052 = vmatmul.mubr.msk.bf16.gmra.mrb[4].mxu1 %vm403_vm0, %v1146_v10 }
  0x29   : > { %1039 = vmatprep.mubr.msk.bf16.mxu0 %vm403_vm0, %v1147_v11  ;;  %1055 = vmatprep.mubr.msk.bf16.mxu1 %vm403_vm0, %v1148_v12 }
  0x30   : > { %1040 = vmatmul.mubr.msk.bf16.gmra.mrb[8].mxu0 %vm403_vm0, %v1149_v13  ;;  %1056 = vmatmul.mubr.msk.bf16.gmra.mrb[8].mxu1 %vm403_vm0, %v1150_v14 }
  0x31   : > { %1043 = vmatprep.mubr.msk.bf16.mxu0 %vm403_vm0, %v1151_v15  ;;  %1059 = vmatprep.mubr.msk.bf16.mxu1 %vm403_vm0, %v1152_v16 }
  0x38   : > { %1044 = vmatmul.mubr.msk.bf16.gmra.mrb[12].mxu0 %vm403_vm0, %v1153_v17  ;;  %1060 = vmatmul.mubr.msk.bf16.gmra.mrb[12].mxu1 %vm403_vm0, %v1154_v18 }
  0x39   : > { %722 = vmatprep.mubr.f32.mxu1 %v655_v20 }
  0xf3   : > { %v1033_v22 = vpop.f32.mrb[0].mxu0  ;;  %v1049_v23 = vpop.f32.mrb[0].mxu1 }
  0xf4   : > { %v495_v24 = vadd.f32 %v1033_v22, %v1309_v21  ;;  %v559_v25 = vadd.f32 %v1049_v23, %v1309_v21  ;;  %v486_v26 = vpop.f32.mrb[1].mxu0  ;;  %v550_v27 = vpop.f32.mrb[1].mxu1 }
  0xf5   : > { %v487_v28 = vadd.f32 %v1309_v21, %v486_v26  ;;  %v551_v29 = vadd.f32 %v1309_v21, %v550_v27  ;;  %v1034_v30 = vpop.f32.mrb[2].mxu0  ;;  %v1050_v31 = vpop.f32.mrb[2].mxu1 }
  0xf6   : > { %v615_v32 = vmax.f32 %v495_v24, 0.0  ;;  %v498_v33 = vadd.f32 %v1034_v30, %v1309_v21  ;;  %v562_v34 = vadd.f32 %v1050_v31, %v1309_v21  ;;  %v489_v35 = vpop.f32.mrb[3].mxu0  ;;  %v553_v36 = vpop.f32.mrb[3].mxu1  ;;  %v631_v39 = vmax.f32 %v559_v25, 0.0 }
  0xf7   : > { %v490_v37 = vadd.f32 %v1309_v21, %v489_v35  ;;  %v554_v38 = vadd.f32 %v1309_v21, %v553_v36  ;;  %v613_v42 = vmax.f32 %v487_v28, 0.0  ;;  %v629_v43 = vmax.f32 %v551_v29, 0.0 }
  0xf8   : > { %v616_v40 = vmax.f32 %v498_v33, 0.0  ;;  %v632_v41 = vmax.f32 %v562_v34, 0.0 }
  0xf9   : > { %v614_v44 = vmax.f32 %v490_v37, 0.0  ;;  %v630_v45 = vmax.f32 %v554_v38, 0.0 }
  0xfa   : > { %v1089_v46 = vpack.c.bf16 %v616_v40, %v615_v32  ;;  %v1087_v47 = vpack.c.bf16 %v632_v41, %v631_v39 }
  0xfb   : > { %v1085_v48 = vpack.c.bf16 %v614_v44, %v613_v42  ;;  %v1083_v49 = vpack.c.bf16 %v630_v45, %v629_v43  ;;  %v1037_v50 = vpop.f32.mrb[4].mxu0  ;;  %v1053_v51 = vpop.f32.mrb[4].mxu1 }
  0xfc   : > { %v511_v52 = vadd.f32 %v1037_v50, %v1309_v21  ;;  %v575_v53 = vadd.f32 %v1053_v51, %v1309_v21  ;;  %v502_v54 = vpop.f32.mrb[5].mxu0  ;;  %v566_v55 = vpop.f32.mrb[5].mxu1 }
  0xfd   : > { %v503_v56 = vadd.f32 %v1309_v21, %v502_v54  ;;  %v567_v57 = vadd.f32 %v1309_v21, %v566_v55  ;;  %v1038_v58 = vpop.f32.mrb[6].mxu0  ;;  %v1054_v59 = vpop.f32.mrb[6].mxu1  ;;  %1084 = vmatprep.subr.bf16.mxu1 %v1083_v49 }
  0xfe   : > { %v619_v60 = vmax.f32 %v511_v52, 0.0  ;;  %v514_v61 = vadd.f32 %v1038_v58, %v1309_v21  ;;  %v578_v62 = vadd.f32 %v1054_v59, %v1309_v21  ;;  %v505_v63 = vpop.f32.mrb[7].mxu0  ;;  %v569_v0 = vpop.f32.mrb[7].mxu1  ;;  %1086 = vmatpush3.bf16.msra.mxu1 %v1085_v48  ;;  %v635_v3 = vmax.f32 %v575_v53, 0.0 }
  0xff   : > { %v506_v1 = vadd.f32 %v1309_v21, %v505_v63  ;;  %v570_v2 = vadd.f32 %v1309_v21, %v569_v0  ;;  %1088 = vmatprep.subr.bf16.mxu1 %v1087_v47  ;;  %v617_v6 = vmax.f32 %v503_v56, 0.0  ;;  %v633_v7 = vmax.f32 %v567_v57, 0.0 }
 0x100   : > { %v620_v4 = vmax.f32 %v514_v61, 0.0  ;;  %v636_v5 = vmax.f32 %v578_v62, 0.0 }
 0x101   : > { %v618_v8 = vmax.f32 %v506_v1, 0.0  ;;  %v634_v9 = vmax.f32 %v570_v2, 0.0 }
 0x102   : > { %v1097_v10 = vpack.c.bf16 %v620_v4, %v619_v60  ;;  %v1095_v11 = vpack.c.bf16 %v636_v5, %v635_v3  ;;  %1090 = vmatpush3.bf16.msra.mxu1 %v1089_v46 }
 0x103   : > { %v1093_v12 = vpack.c.bf16 %v618_v8, %v617_v6  ;;  %v1091_v13 = vpack.c.bf16 %v634_v9, %v633_v7  ;;  %v1041_v14 = vpop.f32.mrb[8].mxu0  ;;  %v1057_v15 = vpop.f32.mrb[8].mxu1  ;;  %v645_v8 = vld [vmem:[#allocation2] sm:$0x3] }
 0x104   : > { %v527_v16 = vadd.f32 %v1041_v14, %v1309_v21  ;;  %v591_v17 = vadd.f32 %v1057_v15, %v1309_v21  ;;  %v518_v18 = vpop.f32.mrb[9].mxu0  ;;  %v582_v20 = vpop.f32.mrb[9].mxu1  ;;  %v1157_v14 = vld [vmem:[%s1402_s4 + $0x10] sm:$0xff] (!%p951_p6)   ;;  %v1158_v15 = vld [vmem:[%s1402_s4 + $0x18] sm:$0xff] (!%p951_p6)  }
 0x105   : > { %v519_v22 = vadd.f32 %v1309_v21, %v518_v18  ;;  %v583_v23 = vadd.f32 %v1309_v21, %v582_v20  ;;  %v1042_v24 = vpop.f32.mrb[10].mxu0  ;;  %v1058_v25 = vpop.f32.mrb[10].mxu1  ;;  %1092 = vmatprep.subr.bf16.mxu1 %v1091_v13  ;;  %v1202_v13 = vmov (!%p951_p6), 0.0   ;;  %v1161_v18 = vld [vmem:[%s1402_s4 + $0x30] sm:$0xff] (!%p951_p6)   ;;  %v1162_v20 = vld [vmem:[%s1402_s4 + $0x38] sm:$0xff] (!%p951_p6)  }
 0x106   : > { %v623_v26 = vmax.f32 %v527_v16, 0.0  ;;  %v530_v27 = vadd.f32 %v1042_v24, %v1309_v21  ;;  %v594_v28 = vadd.f32 %v1058_v25, %v1309_v21  ;;  %v521_v29 = vpop.f32.mrb[11].mxu0  ;;  %v585_v30 = vpop.f32.mrb[11].mxu1  ;;  %1094 = vmatpush3.bf16.msra.mxu1 %v1093_v12  ;;  %v639_v33 = vmax.f32 %v591_v17, 0.0  ;;  %v1155_v12 = vld [vmem:[%s1402_s4] sm:$0xff] (!%p951_p6)   ;;  %1063 = vmatprep.subr.bf16.mxu0 (!%p951_p6), %v1202_v13  ;;  %v1160_v17 = vld [vmem:[%s1402_s4 + $0x28] sm:$0xff] (!%p951_p6)  }
 0x107   : > { %v522_v31 = vadd.f32 %v1309_v21, %v521_v29  ;;  %v586_v32 = vadd.f32 %v1309_v21, %v585_v30  ;;  %1096 = vmatprep.subr.bf16.mxu1 %v1095_v11  ;;  %v621_v36 = vmax.f32 %v519_v22, 0.0  ;;  %v637_v37 = vmax.f32 %v583_v23, 0.0  ;;  %1064 = vmatpush3.bf16.msra.mxu0 (!%p951_p6), %v1155_v12  ;;  %v1159_v16 = vld [vmem:[%s1402_s4 + $0x20] sm:$0xff] (!%p951_p6)  }
 0x108   : > { %v624_v34 = vmax.f32 %v530_v27, 0.0  ;;  %v640_v35 = vmax.f32 %v594_v28, 0.0  ;;  %1079 = vmatprep.mubr.msk.bf16.mxu0 (!%p951_p6), %vm1203_vm1, %v1202_v13  ;;  %1065 = vmatprep.subr.bf16.mxu0 (!%p951_p6), %v1202_v13  ;;  %v952_v24 = vld [vmem:[%s1403_s5] ss:$0 sm:$0xff] (!%p951_p6) }
 0x109   : > { %v622_v38 = vmax.f32 %v522_v31, 0.0  ;;  %v638_v39 = vmax.f32 %v586_v32, 0.0 }
 0x10a   : > { %v1105_v40 = vpack.c.bf16 %v624_v34, %v623_v26  ;;  %v1103_v41 = vpack.c.bf16 %v640_v35, %v639_v33  ;;  %1098 = vmatpush3.bf16.msra.mxu1 %v1097_v10 }
 0x10b   : > { %v1101_v42 = vpack.c.bf16 %v622_v38, %v621_v36  ;;  %v1099_v43 = vpack.c.bf16 %v638_v39, %v637_v37  ;;  %v1045_v44 = vpop.f32.mrb[12].mxu0  ;;  %v1061_v45 = vpop.f32.mrb[12].mxu1 }
 0x10c   : > { %v543_v46 = vadd.f32 %v1045_v44, %v1309_v21  ;;  %v607_v47 = vadd.f32 %v1061_v45, %v1309_v21  ;;  %v534_v48 = vpop.f32.mrb[13].mxu0  ;;  %v598_v49 = vpop.f32.mrb[13].mxu1 }
 0x10d   : > { %v535_v50 = vadd.f32 %v1309_v21, %v534_v48  ;;  %v599_v51 = vadd.f32 %v1309_v21, %v598_v49  ;;  %v1046_v52 = vpop.f32.mrb[14].mxu0  ;;  %v1062_v53 = vpop.f32.mrb[14].mxu1  ;;  %1100 = vmatprep.subr.bf16.mxu1 %v1099_v43 }
 0x10e   : > { %v627_v54 = vmax.f32 %v543_v46, 0.0  ;;  %v546_v55 = vadd.f32 %v1046_v52, %v1309_v21  ;;  %v610_v56 = vadd.f32 %v1062_v53, %v1309_v21  ;;  %v537_v57 = vpop.f32.mrb[15].mxu0  ;;  %v601_v58 = vpop.f32.mrb[15].mxu1  ;;  %1102 = vmatpush3.bf16.msra.mxu1 %v1101_v42  ;;  %v643_v61 = vmax.f32 %v607_v47, 0.0 }
 0x10f   : > { %v538_v59 = vadd.f32 %v1309_v21, %v537_v57  ;;  %v602_v60 = vadd.f32 %v1309_v21, %v601_v58  ;;  %1104 = vmatprep.subr.bf16.mxu1 %v1103_v41  ;;  %v625_v0 = vmax.f32 %v535_v50, 0.0  ;;  %v641_v1 = vmax.f32 %v599_v51, 0.0 }
 0x110   : > { %v628_v62 = vmax.f32 %v546_v55, 0.0  ;;  %v644_v63 = vmax.f32 %v610_v56, 0.0 }
 0x111   : > { %v626_v2 = vmax.f32 %v538_v59, 0.0  ;;  %v642_v3 = vmax.f32 %v602_v60, 0.0 }
 0x112   : > { %v1113_v4 = vpack.c.bf16 %v628_v62, %v627_v54  ;;  %v1111_v5 = vpack.c.bf16 %v644_v63, %v643_v61  ;;  %1106 = vmatpush3.bf16.msra.mxu1 %v1105_v40 }
 0x113   : > { %v1109_v6 = vpack.c.bf16 %v626_v2, %v625_v0  ;;  %v1107_v7 = vpack.c.bf16 %v642_v3, %v641_v1 }
 0x115   : > { %1108 = vmatprep.subr.bf16.mxu1 %v1107_v7 }
 0x116   : > { %1110 = vmatpush3.bf16.msra.mxu1 %v1109_v6 }
 0x117   : > { %1112 = vmatprep.subr.bf16.mxu1 %v1111_v5 }
 0x11a   : > { %1114 = vmatpush3.bf16.msra.mxu1 %v1113_v4 }
 0x11d   : > { %723 = vmatmul.mubr.f32.vlgmr.msra.gmra.mrb[16].mxu1 %v1302_v19  ;;  %v1156_v19 = vld [vmem:[%s1402_s4 + $0x8] sm:$0xff] (!%p951_p6)  }
 0x11e   : > { %1066 = vmatpush3.bf16.msra.mxu0 (!%p951_p6), %v1156_v19 }
 0x11f   : > { %1067 = vmatprep.subr.bf16.mxu0 (!%p951_p6), %v1202_v13 }
 0x122   : > { %1068 = vmatpush3.bf16.msra.mxu0 (!%p951_p6), %v1157_v14 }
 0x123   : > { %1069 = vmatprep.subr.bf16.mxu0 (!%p951_p6), %v1202_v13 }
 0x126   : > { %1070 = vmatpush3.bf16.msra.mxu0 (!%p951_p6), %v1158_v15 }
 0x127   : > { %1071 = vmatprep.subr.bf16.mxu0 (!%p951_p6), %v1202_v13 }
 0x12a   : > { %1072 = vmatpush3.bf16.msra.mxu0 (!%p951_p6), %v1159_v16 }
 0x12b   : > { %1073 = vmatprep.subr.bf16.mxu0 (!%p951_p6), %v1202_v13 }
 0x12e   : > { %1074 = vmatpush3.bf16.msra.mxu0 (!%p951_p6), %v1160_v17 }
 0x12f   : > { %1075 = vmatprep.subr.bf16.mxu0 (!%p951_p6), %v1202_v13 }
 0x132   : > { %1076 = vmatpush3.bf16.msra.mxu0 (!%p951_p6), %v1161_v18 }
 0x133   : > { %1077 = vmatprep.subr.bf16.mxu0 (!%p951_p6), %v1202_v13 }
 0x136   : > { %1078 = vmatpush3.bf16.msra.mxu0 (!%p951_p6), %v1162_v20 }
 0x1f0   : > { %v1015_v21 = vpop.f32.mrb[16].mxu1  ;;  %733 = sbr.rel (%p951_p6) target bundleno = 727 (0x2d7), region = 52 }
 0x1f1   : > { %v1016_v9 = vpop.f32.mrb[17].mxu1 }
 0x1f2   : > { %v1017_v10 = vadd.f32 %v1016_v9, %v1015_v21 }
 0x1f4   : > { %v728_v11 = vadd.f32 %v1017_v10, %v645_v8 }
 0x1f6   : > { %729 = vst [vmem:[#allocation2] sm:$0x3] %v728_v11 }
 0x1fd   : > { %v734_v22 = vld [vmem:[#allocation2] sm:$0x3] }
 0x1fe   : > { %v735_v23 = vpack.c.bf16 %v734_v22, %v734_v22 }
 0x200   : > { %1080 = vmatmul.mubr.bf16.vlgmr.msra.gmra.mrb[0].mxu0 %v735_v23 }
 0x2d3   : > { %v841_v25 = vpop.f32.mrb[0].mxu0 }
 0x2d4   : > { %v842_v26 = vadd.f32 %v952_v24, %v841_v25  ;;  %v1081_v27 = vpop.f32.mrb[1].mxu0 }
 0x2d5   : > { %v844_v28 = vpop.f32.mrb[2].mxu0 }
 0x2d6   : > { %847 = vst [vmem:[#allocation3] sm:$0x3] %v842_v26  ;;  %v1082_v29 = vpop.f32.mrb[3].mxu0 }
 0x2d7 PF: > { %p1123_p7 = scmp.eq.s32.totalorder %s1246_s22, 1  ;;  %s1204_s11 = smov [#allocation3]  }
 0x2d8   : > { %s855_s12 = sshll.u32 %s1204_s11, 4  ;;  %s856_s12 = int_to_ptr.vmem [resolvable:$true] %s855_s12 }
 0x2d9   : > { %s1163_s13 = scalar_lea.vmem %s856_s12, 32  ;;  %p1170_p11 = scmp.lt.s32.totalorder %s856_s12, %s856_s12 }
 0x2da   : > { %p1164_p8 = scmp.ne.s32.totalorder %s856_s12, %s1163_s13  ;;  %p1171_p12 = scmp.lt.s32.totalorder %s1163_s13, %s1163_s13 }
 0x2dc   : > { %p1165_p9 = pnand %p1164_p8, %p1123_p7  ;;  %p1172_p13 = por %p1171_p12, %p1170_p11 }
 0x2de   : > { %p1166_p10 = pneg %p1165_p9 }
 0x2e0   : > { %p1173_p0 = pnand %p1172_p13, %p1166_p10 }
 0x2e2   : > { %1176 = shalt.err (!%p1173_p0)
}
 0x2e3   : > { %s1177_s16 = scalar_lea.hbm %s1404_s6, 32 }
 0x2e4   : > { %p1178_p1 = scmp.ne.s32.totalorder %s1404_s6, %s1177_s16  ;;  %p1183_p4 = scmp.lt.u32.totalorder %s1177_s16, %s1404_s6 }
 0x2e6   : > { %p1179_p2 = pnand %p1178_p1, %p1123_p7 }
 0x2e8   : > { %p1180_p3 = pneg %p1179_p2 }
 0x2ea   : > { %p1185_p5 = pnand %p1183_p4, %p1180_p3 }
 0x2ec   : > { %1188 = shalt.err (!%p1185_p5)
}
 0x2ed   : > { %1120 = dma.vmem_to_hbm [thread:$0]  (%p1123_p7), %s856_s12, 32, %s1404_s6, [#allocation4]  }
 0x2ee   : > { %1194 = dma.done.wait (%p1123_p7), [#allocation4], 32  }
 0x2ef   : > { %1196 = vsyncadd (%p1123_p7), [#allocation4], 4294967264 }
 0x2f0 PF: > { %s17_s21 = sadd.s32 1, %s1199_s21  }
 0x2f1   : > { %p14_p6 = scmp.ge.s32.totalorder %s17_s21, 4  }
 0x2f3   :  { %16 = sbr.rel (!%p14_p6) target bundleno = 1 (0x1), region = 82 }
 0x2fa   :  { %868 = vsyncpa [#allocation4], 1 }
 0x2fb   :  { %870 = vsyncpa [#allocation4 + $0x1], 1 }

</bundles_post_ra>
